<compile_context>
chip_gen: v7x
topology: tpu7x:2x2x1
jax: 0.10.0
libtpu: 0.0.40
codegen_flags: <defaults>
</compile_context>

<pallas_src>
import functools

import jax
import jax.numpy as jnp
from jax.experimental import pallas as pl
from jax.experimental.pallas import tpu as pltpu

_LANE = 128          # vreg lane width
_BF16_SUBLANE = 16   # bf16 sublane packing depth


def _round_up(x, m):
    return ((x + m - 1) // m) * m


def _cdiv(a, b):
    return (a + b - 1) // b


def _vmem_limit_bytes():
    """Per-generation scoped-VMEM limit (~100 MiB v5e/v6e, ~48 MiB v7x)."""
    cap = 128 * 1024 * 1024
    try:
        info = pltpu.get_tpu_info()
        cap = int(getattr(info, "vmem_capacity_bytes", cap))
    except Exception:
        pass
    return max(32 * 1024 * 1024, min(cap - 16 * 1024 * 1024, 100 * 1024 * 1024))


# ------------------------------ Pallas kernels --------------------------------

def _gcn_matmul_kernel(x_ref, k_ref, b_ref, o_ref):
    """Single-K-block tile of  y = x @ Kmat + bias  (bf16 in, f32 accumulate)."""
    acc = jnp.dot(x_ref[...], k_ref[...], preferred_element_type=jnp.float32)
    o_ref[...] = (acc + b_ref[...]).astype(o_ref.dtype)


def _gcn_matmul_acc_kernel(x_ref, k_ref, b_ref, o_ref, acc_ref):
    """K-tiled variant: f32 VMEM accumulator, init at k==0, finalize at k==last."""
    @pl.when(pl.program_id(2) == 0)
    def _():
        acc_ref[...] = jnp.zeros_like(acc_ref)

    acc_ref[...] += jnp.dot(x_ref[...], k_ref[...],
                            preferred_element_type=jnp.float32)

    @pl.when(pl.program_id(2) == pl.num_programs(2) - 1)
    def _():
        o_ref[...] = (acc_ref[...] + b_ref[...]).astype(o_ref.dtype)


# ----------------------------- parameter folding ------------------------------

def fold_gcn_params(supports, weight, bias, order=2):
    """Fold the support power-chain and the 1x1-conv weight into one operator.

    supports: list of (V, V) adjacency matrices
    weight:   (C_out, (order*len(supports)+1)*C_in)   (squeezed 1x1-conv weight)
    bias:     (C_out,)
    Returns (kmat bf16 (V*C_in, N_pad), bias_row f32 (1, N_pad)) with
    N_pad = round_up(V*C_out, 128) for lane-dense output stores.
    """
    c_out, c_total = weight.shape
    n_sup = len(supports)
    nblk = order * n_sup + 1
    assert c_total % nblk == 0, (c_total, nblk)
    c_in = c_total // nblk
    v = supports[0].shape[0]

    # Block order matches the PyTorch channel concat: [I, A1, A1^2, A2, A2^2, ...].
    blocks = [jnp.eye(v, dtype=jnp.float32)]
    for a in supports:
        a32 = a.astype(jnp.float32)
        ak = a32
        blocks.append(ak)
        for _ in range(2, order + 1):
            ak = ak @ a32
            blocks.append(ak)
    p_stack = jnp.stack(blocks, axis=0)                          # (nblk, V, V)
    w_stack = weight.astype(jnp.float32).reshape(c_out, nblk, c_in)

    # Kmat[(v, c), (w, o)] = sum_k P_k[v, w] * W_k[o, c]
    kmat = jnp.einsum("kvw,okc->vcwo", p_stack, w_stack).reshape(v * c_in, v * c_out)
    bias_row = jnp.tile(bias.astype(jnp.float32), v)[None, :]    # (1, V*C_out)

    # Pad the output dim to a multiple of 128 -> unmasked lane-dense stores.
    n_valid = v * c_out
    n_pad = _round_up(n_valid, _LANE)
    if n_pad != n_valid:
        kmat = jnp.pad(kmat, ((0, 0), (0, n_pad - n_valid)))
        bias_row = jnp.pad(bias_row, ((0, 0), (0, n_pad - n_valid)))

    # K (= V*C_in) is left unpadded on purpose: a full-K block satisfies the
    # "(multiple of 128) OR (full dim)" rule, and padding it here would inflate
    # the streamed activation bytes.  gcn_apply pads K only when it tiles K.
    # NOTE: kmat is stored bf16 (MXU operand dtype); keep f32 if tighter parity
    # with the fp32 PyTorch reference is needed at very large V.
    return kmat.astype(jnp.bfloat16), bias_row


# ------------------------------- tile selection --------------------------------

def _select_tiles(m_rows, k_dim, n_pad, out_bytes, vmem_budget, block_rows):
    """Pick (tile_m, tile_k, tile_n) honoring alignment + double-buffered VMEM."""
    # --- M tile: multiple of 16 (bf16 sublanes), snapped to 128/256 when large ---
    tile_m = min(block_rows, _round_up(m_rows, _BF16_SUBLANE))
    if tile_m >= 512:
        tile_m = (tile_m // 256) * 256
    elif tile_m >= 256:
        tile_m = 256
    elif tile_m >= 128:
        tile_m = 128
    else:
        tile_m = _round_up(tile_m, _BF16_SUBLANE)
    # Keep >= 2 M-steps when possible so both v7x TensorCores get work.
    if _cdiv(m_rows, tile_m) < 2 and m_rows > _BF16_SUBLANE:
        tile_m = max(_BF16_SUBLANE, _round_up(_cdiv(m_rows, 2), _BF16_SUBLANE))
    tile_m = min(tile_m, _round_up(m_rows, 8))       # never exceed the array

    # --- N tile: lane dim, multiple of 128, resident when small ---
    tile_n = n_pad if n_pad <= 2048 else 1024

    # --- K tile: keep the whole contraction resident (single step) when it fits ---
    tile_k = k_dim if k_dim <= 8192 else 4096

    def fits(tm, tk, tn):
        b = 2 * tm * tk * 2           # x tiles (bf16), double-buffered
        b += 2 * tk * tn * 2          # folded operator tiles (bf16), double-buffered
        b += 2 * tn * 4 * 2           # bias row (f32), double-buffered
        b += 2 * tm * tn * out_bytes  # output tiles
        if tk < k_dim:
            b += tm * tn * 4          # f32 accumulator scratch
        return b <= vmem_budget

    while not fits(tile_m, tile_k, tile_n):
        if tile_k > 512:
            tile_k = max(512, _round_up(tile_k // 2, _LANE))
        elif tile_n > 256:
            tile_n = max(256, tile_n // 2)
        elif tile_m > _BF16_SUBLANE:
            tile_m = max(_BF16_SUBLANE, (tile_m // 2 // _BF16_SUBLANE) * _BF16_SUBLANE)
        else:
            break
    return tile_m, tile_k, tile_n


# ----------------------------------- forward -----------------------------------

def gcn_apply(x, kmat, bias_row, *, c_out, block_rows=512, out_dtype=None,
              tiles=None):
    """Fused gcn forward: x (N, C_in, V, L) -> y (N, C_out, V, L)."""
    n, c_in, v, l = x.shape
    k_dim, n_pad = kmat.shape
    n_valid = v * c_out
    assert k_dim == v * c_in, (k_dim, v, c_in)
    assert n_pad >= n_valid and n_pad % _LANE == 0, (n_pad, n_valid)

    out_dtype = x.dtype if out_dtype is None else out_dtype
    out_bytes = jnp.dtype(out_dtype).itemsize
    m_rows = n * l

    vmem_limit = _vmem_limit_bytes()
    if tiles is None:
        tile_m, tile_k, tile_n = _select_tiles(
            m_rows, k_dim, n_pad, out_bytes, int(0.75 * vmem_limit), block_rows)
    else:
        tile_m, tile_k, tile_n = tiles

    m_blocks = _cdiv(m_rows, tile_m)
    n_blocks = _cdiv(n_pad, tile_n)
    k_blocks = _cdiv(k_dim, tile_k)
    k_total = k_blocks * tile_k

    # Single entry relayout (one fused XLA copy): (N, C_in, V, L) -> (N*L, V*C_in)
    # in bf16.  The M tail is handled by Pallas' masked edge blocks, not jnp.pad.
    x2 = jnp.transpose(x, (0, 3, 2, 1)).reshape(m_rows, k_dim).astype(jnp.bfloat16)
    if k_total != k_dim:                 # only when K itself is tiled
        x2 = jnp.pad(x2, ((0, 0), (0, k_total - k_dim)))
        kmat = jnp.pad(kmat, ((0, k_total - k_dim), (0, 0)))

    if k_blocks == 1:
        kernel = _gcn_matmul_kernel
        scratch = ()
    else:
        kernel = _gcn_matmul_acc_kernel
        scratch = (pltpu.VMEM((tile_m, tile_n), jnp.float32),)

    y2 = pl.pallas_call(
        kernel,
        out_shape=jax.ShapeDtypeStruct((m_rows, n_pad), out_dtype),
        grid=(m_blocks, n_blocks, k_blocks),
        in_specs=[
            # streamed activation tiles (double-buffered by the pipeline)
            pl.BlockSpec((tile_m, tile_k), lambda i, j, k: (i, k)),
            # folded graph+conv operator tiles (resident when n_blocks==k_blocks==1)
            pl.BlockSpec((tile_k, tile_n), lambda i, j, k: (k, j)),
            # bias row
            pl.BlockSpec((1, tile_n), lambda i, j, k: (0, j)),
        ],
        out_specs=pl.BlockSpec((tile_m, tile_n), lambda i, j, k: (i, j)),
        scratch_shapes=scratch,
        compiler_params=pltpu.CompilerParams(
            dimension_semantics=("parallel", "parallel", "arbitrary"),
            vmem_limit_bytes=int(vmem_limit),
        ),
    )(x2, kmat, bias_row)

    # Single exit transform: drop N padding and go back to (N, C_out, V, L).
    y = jnp.transpose(y2[:, :n_valid].reshape(n, l, v, c_out), (0, 3, 2, 1))
    # TODO(synk): F.dropout is identity in inference mode; training-mode dropout
    # with PyTorch RNG parity is not reproduced here.
    return y


def gcn_forward(x, supports, weight, bias, order=2, dropout=0.3, training=False,
                block_rows=512, out_dtype=None):
    """Convenience wrapper matching the PyTorch module's forward signature."""
    kmat, bias_row = fold_gcn_params(supports, weight, bias, order=order)
    return gcn_apply(x, kmat, bias_row, c_out=weight.shape[0],
                     block_rows=block_rows, out_dtype=out_dtype)


# ------------------------------ plain-JAX reference -----------------------------

def _reference_gcn(x, supports, weight, bias, order=2):
    hp = jax.lax.Precision.HIGHEST
    out = [x]
    for a in supports:
        x1 = jnp.einsum("ncvl,vw->ncwl", x, a, precision=hp)
        out.append(x1)
        for _ in range(2, order + 1):
            x1 = jnp.einsum("ncvl,vw->ncwl", x1, a, precision=hp)
            out.append(x1)
    h = jnp.concatenate(out, axis=1)
    y = jnp.einsum("oc,ncvl->novl", weight, h, precision=hp)
    return y + bias[None, :, None, None]


# ------------------------------------ main ---------------------------------------

if __name__ == "__main__":
    key = jax.random.PRNGKey(0)

    # ---- Test 1: toy shapes, resident-operator (single K block) fast path ----
    N, C_IN, V, L = 2, 4, 16, 16
    SUPPORT_LEN, ORDER, C_OUT = 3, 2, 8
    C_TOTAL = (ORDER * SUPPORT_LEN + 1) * C_IN      # 28

    keys = jax.random.split(key, 3 + SUPPORT_LEN)
    x = jax.random.normal(keys[0], (N, C_IN, V, L), dtype=jnp.float32)
    supports = [
        jax.nn.softmax(
            jax.random.normal(keys[3 + i], (V, V), dtype=jnp.float32), axis=-1)
        for i in range(SUPPORT_LEN)
    ]
    bound = 1.0 / (C_TOTAL ** 0.5)
    weight = jax.random.uniform(keys[1], (C_OUT, C_TOTAL), minval=-bound,
                                maxval=bound, dtype=jnp.float32)
    bias = jax.random.uniform(keys[2], (C_OUT,), minval=-bound, maxval=bound,
                              dtype=jnp.float32)

    kmat, bias_row = fold_gcn_params(supports, weight, bias, order=ORDER)
    gcn_fn = jax.jit(functools.partial(gcn_apply, c_out=C_OUT))

    y = jax.block_until_ready(gcn_fn(x, kmat, bias_row))
    assert y.shape == (N, C_OUT, V, L), y.shape

    y_ref = _reference_gcn(x, supports, weight, bias, order=ORDER)
    max_err = float(jnp.max(jnp.abs(y - y_ref)))
    assert max_err < 5e-2, f"max abs err {max_err}"

    # ---- Test 2: exercise the K/N-tiled accumulator path (production-scale
    # configuration on v7x) at a slightly larger toy size with unaligned V*C. ----
    V2, C_IN2 = 28, 8
    C_TOTAL2 = (ORDER * SUPPORT_LEN + 1) * C_IN2     # 56
    x2 = jax.random.normal(keys[0], (N, C_IN2, V2, L), dtype=jnp.float32)
    supports2 = [
        jax.nn.softmax(
            jax.random.normal(keys[3 + i], (V2, V2), dtype=jnp.float32), axis=-1)
        for i in range(SUPPORT_LEN)
    ]
    bound2 = 1.0 / (C_TOTAL2 ** 0.5)
    weight2 = jax.random.uniform(keys[1], (C_OUT, C_TOTAL2), minval=-bound2,
                                 maxval=bound2, dtype=jnp.float32)
    bias2 = jax.random.uniform(keys[2], (C_OUT,), minval=-bound2, maxval=bound2,
                               dtype=jnp.float32)

    kmat2, bias_row2 = fold_gcn_params(supports2, weight2, bias2, order=ORDER)
    gcn_fn2 = jax.jit(functools.partial(gcn_apply, c_out=C_OUT,
                                        tiles=(16, 128, 128)))
    y2v = jax.block_until_ready(gcn_fn2(x2, kmat2, bias_row2))
    assert y2v.shape == (N, C_OUT, V2, L), y2v.shape
    y2_ref = _reference_gcn(x2, supports2, weight2, bias2, order=ORDER)
    max_err2 = float(jnp.max(jnp.abs(y2v - y2_ref)))
    assert max_err2 < 5e-2, f"max abs err (tiled path) {max_err2}"

    print("KERNEL_OK")
</pallas_src>

<mosaic_0001>
module attributes {stable_mosaic.version = 11 : i64} {
  func.func @_gcn_matmul_kernel(%arg0: i32, %arg1: i32, %arg2: i32, %arg3: memref<16x64xbf16, #tpu.memory_space<vmem>>, %arg4: memref<64x128xbf16, #tpu.memory_space<vmem>>, %arg5: memref<1x128xf32, #tpu.memory_space<vmem>>, %arg6: memref<16x128xf32, #tpu.memory_space<vmem>>) attributes {dimension_semantics = [#tpu.dimension_semantics<parallel>, #tpu.dimension_semantics<parallel>, #tpu.dimension_semantics<arbitrary>], iteration_bounds = array<i64: 2, 1, 1>, scalar_prefetch = 0 : i64, scratch_operands = 0 : i64, tpu.core_type = #tpu.core_type<tc>, window_params = [{transform_indices = @transform_0, window_bounds = array<i64: 16, 64>}, {transform_indices = @transform_1, window_bounds = array<i64: 64, 128>}, {transform_indices = @transform_2, window_bounds = array<i64: 1, 128>}, {transform_indices = @transform_3, window_bounds = array<i64: 16, 128>}]} {
    %c0 = arith.constant 0 : index
    %c0_0 = arith.constant 0 : index
    %0 = vector.load %arg3[%c0, %c0_0] : memref<16x64xbf16, #tpu.memory_space<vmem>>, vector<16x64xbf16>
    %c0_1 = arith.constant 0 : index
    %c0_2 = arith.constant 0 : index
    %1 = vector.load %arg4[%c0_1, %c0_2] : memref<64x128xbf16, #tpu.memory_space<vmem>>, vector<64x128xbf16>
    %cst = arith.constant dense<0.000000e+00> : vector<16x128xf32>
    %2 = tpu.matmul %0, %1, %cst {dimension_numbers = #tpu.dot_dimension_numbers<[1], [0], [0], [1], [0, 0, 1, 1], [], []>} : vector<16x64xbf16>, vector<64x128xbf16>, vector<16x128xf32> -> vector<16x128xf32>
    %c0_3 = arith.constant 0 : index
    %c0_4 = arith.constant 0 : index
    %3 = vector.load %arg5[%c0_3, %c0_4] : memref<1x128xf32, #tpu.memory_space<vmem>>, vector<1x128xf32>
    %4 = vector.broadcast %3 : vector<1x128xf32> to vector<16x128xf32>
    %5 = arith.addf %2, %4 : vector<16x128xf32>
    %c0_5 = arith.constant 0 : index
    %c0_6 = arith.constant 0 : index
    %6 = vector.load %arg6[%c0_5, %c0_6] : memref<16x128xf32, #tpu.memory_space<vmem>>, vector<16x128xf32>
    tpu.vector_store %arg6[%c0_5, %c0_6], %5 {strides = array<i32>} : memref<16x128xf32, #tpu.memory_space<vmem>>, vector<16x128xf32>,
    return
  }
  func.func @transform_0(%arg0: i32, %arg1: i32, %arg2: i32) -> (i32, i32) {
    %c0_i32 = arith.constant 0 : i32
    return %arg0, %arg2 : i32, i32
  }
  func.func @transform_1(%arg0: i32, %arg1: i32, %arg2: i32) -> (i32, i32) {
    %c0_i32 = arith.constant 0 : i32
    return %arg2, %arg1 : i32, i32
  }
  func.func @transform_2(%arg0: i32, %arg1: i32, %arg2: i32) -> (i32, i32) {
    %c0_i32 = arith.constant 0 : i32
    %c0_i32_0 = arith.constant 0 : i32
    return %c0_i32, %arg1 : i32, i32
  }
  func.func @transform_3(%arg0: i32, %arg1: i32, %arg2: i32) -> (i32, i32) {
    %c0_i32 = arith.constant 0 : i32
    return %arg0, %arg1 : i32, i32
  }
}

</mosaic_0001>

<bundles_post_ra>
// kernel: gcn_apply.1
= control target key start
LH: loop header
LB: loop body
LE: loop exit
PB: predicated region body
PF: predicated region fallthrough
CT: control target
= control target key end

     0   :  { %8 = vsyncpa [#allocation3], 0  ;;  %s1089_s0 = inlined_call_operand.hbm [shape: bf16[32,64], index: 0, kind: input, shape index: {}]   ;;  %s1090_s1 = inlined_call_operand.hbm [shape: bf16[64,128], index: 1, kind: input, shape index: {}]   ;;  %s1091_s2 = inlined_call_operand.hbm [shape: f32[1,128], index: 2, kind: input, shape index: {}]   ;;  %s1092_s3 = inlined_call_operand.hbm [shape: f32[32,128], index: 3, kind: output, shape index: {}]  }
   0x1   :  { %10 = vsyncpa [#allocation3 + $0x1], 0 }
   0x2   :  { %11 = vsyncpa [#allocation6], 0 }
   0x3   :  { %12 = vsyncpa [#allocation4], 0 }
   0x4   :  { %14 = vsyncpa [#allocation4 + $0x1], 0  ;;  %s826_s12 = smov 0   ;;  %s828_s13 = smov 0  }
   0x5   :  { %s830_s14 = smov 0   ;;  %s832_s15 = smov 0  }
   0x6   :  { %s834_s16 = smov 0   ;;  %s836_s17 = smov 0  }
   0x7 LB: > { %s483_s18 = sadd.s32 4294967295, %s794_s17   ;;  %s484_s19 = sadd.s32 4294967294, %s794_s17   ;;  %s794_s17 = sphi %s836_s17, %s20_s17   ;;  %s790_s16 = sphi %s834_s16, %s1114_s16   ;;  %s786_s15 = sphi %s832_s15, %s1113_s15   ;;  %s782_s14 = sphi %s830_s14, %s1112_s14   ;;  %s778_s13 = sphi %s828_s13, %s1111_s13   ;;  %s774_s12 = sphi %s826_s12, %s1110_s12  }
   0x8   : > { %p61_p0 = scmp.ne.s32.totalorder %s778_s13, %s774_s12  ;;  %p860_p1 = scmp.eq.s32.totalorder %s483_s18, 0 }
   0x9   : > { %p864_p2 = scmp.eq.s32.totalorder %s483_s18, 1  ;;  %p147_p3 = scmp.eq.s32.totalorder %s484_s19, 1 }
   0xa   : > { %s1097_s20 = scalar_select %p860_p1, 1, 0 }
   0xb   : > { %p870_p4 = por %p860_p1, %p61_p0  ;;  %p485_p5 = scmp.ge.s32.totalorder %s794_s17, 1 }
   0xc   : > { %p875_p6 = por %p147_p3, %p61_p0  ;;  %p154_p7 = scmp.lt.s32.totalorder %s794_s17, 3 }
   0xd   : > { %s1099_s22 = scalar_select %p870_p4, 1, 0 }
   0xe   : > { %s1100_s23 = scalar_select %p875_p6, 1, 0 }
   0xf   : > { %p880_p8 = pnand %p485_p5, %p154_p7  ;;  %s796_s25 = smov [#allocation5]  }
  0x10   : > { %s170_s26 = sshll.u32 %s796_s25, 4  ;;  %s797_s28 = smov [#allocation7]   ;;  %s884_s26 = int_to_ptr.vmem [resolvable:$true] %s170_s26 }
  0x11   : > { %p540_p9 = pneg %p880_p8  ;;  %s186_s29 = sshll.u32 %s797_s28, 4  ;;  %s895_s29 = int_to_ptr.vmem [resolvable:$true] %s186_s29 }
  0x12   : > { %s622_s5 = scalar_lea.hbm %s1090_s1, 512 }
  0x13   : > { %p891_p11 = pnand %p540_p9, %p860_p1  ;;  %p623_p12 = scmp.ne.s32.totalorder %s1090_s1, %s622_s5 }
  0x14   : > { %p629_p5 = scmp.lt.u32.totalorder %s622_s5, %s1090_s1 }
  0x15   : > { %p624_p13 = pneg %p891_p11 }
  0x17   : > { %p625_p0 = pnand %p624_p13, %p623_p12 }
  0x19   : > { %p626_p3 = pneg %p625_p0 }
  0x1b   : > { %p631_p7 = pnand %p629_p5, %p626_p3 }
  0x1d   : > { %634 = shalt.err (!%p631_p7)
}
  0x1e   : > { %s635_s10 = scalar_lea.vmem %s884_s26, 512  ;;  %p643_p1 = scmp.lt.s32.totalorder %s884_s26, %s884_s26 }
  0x1f   : > { %p636_p9 = scmp.ne.s32.totalorder %s884_s26, %s635_s10  ;;  %p644_p12 = scmp.lt.s32.totalorder %s635_s10, %s635_s10 }
  0x21   : > { %p638_p10 = pnand %p636_p9, %p624_p13  ;;  %p645_p0 = por %p644_p12, %p643_p1 }
  0x23   : > { %p639_p6 = pneg %p638_p10 }
  0x25   : > { %p646_p4 = pnand %p645_p0, %p639_p6 }
  0x27   : > { %649 = shalt.err (!%p646_p4)
}
  0x28   : > { %s798_s11 = smov 64   ;;  %s799_s18 = smov 4  }
  0x29   : > { %543 = dma.hbm_to_vmem [thread:$0]  (!%p891_p11), %s1090_s1, 512, %s884_s26, [#allocation6], %s798_s11, %s798_s11, %s799_s18  }
  0x2a   : > { %s650_s4 = scalar_lea.hbm %s1091_s2, 16 }
  0x2b   : > { %p651_p1 = scmp.ne.s32.totalorder %s1091_s2, %s650_s4  ;;  %p657_p10 = scmp.lt.u32.totalorder %s650_s4, %s1091_s2 }
  0x2d   : > { %p653_p4 = pnand %p651_p1, %p624_p13 }
  0x2f   : > { %p654_p6 = pneg %p653_p4 }
  0x31   : > { %p659_p3 = pnand %p657_p10, %p654_p6 }
  0x33   : > { %662 = shalt.err (!%p659_p3)
}
  0x34   : > { %s663_s26 = scalar_lea.vmem %s895_s29, 16  ;;  %s670_s9 = scalar_lea.vmem %s895_s29, 32 }
  0x35   : > { %p664_p5 = scmp.ne.s32.totalorder %s895_s29, %s663_s26  ;;  %p671_p12 = scmp.lt.s32.totalorder %s895_s29, %s895_s29 }
  0x36   : > { %p672_p0 = scmp.lt.s32.totalorder %s670_s9, %s663_s26 }
  0x37   : > { %p666_p7 = pnand %p664_p5, %p624_p13 }
  0x38   : > { %p673_p1 = por %p672_p0, %p671_p12 }
  0x39   : > { %p667_p9 = pneg %p666_p7 }
  0x3b   : > { %p674_p4 = pnand %p673_p1, %p667_p9 }
  0x3d   : > { %677 = shalt.err (!%p674_p4)
}
  0x3e   : > { %546 = dma.hbm_to_vmem [thread:$0]  (!%p891_p11), %s1091_s2, 16, %s895_s29, [#allocation6]  }
  0x3f   : > { %s39_s25 = sadd.s32 1, %s790_s16  ;;  %s48_s28 = sadd.s32 1, %s782_s14 }
  0x40   : > { %p41_p13 = scmp.ge.s32.totalorder %s39_s25, 2  ;;  %p55_p6 = scmp.ne.s32.totalorder %s782_s14, %s778_s13 }
  0x41   : > { %p56_p10 = scmp.eq.s32.totalorder %s794_s17, 0  ;;  %p557_p3 = scmp.lt.s32.totalorder %s794_s17, 2 }
  0x42   : > { %s1116_s25 = smov (%p41_p13, %s39_s25), 0  ;;  %p963_p7 = por %p864_p2, %p55_p6 }
  0x43   : > { %p57_p5 = por %p56_p10, %p55_p6  ;;  %s43_s30 = ssub.s32 %s790_s16, %s1116_s25 }
  0x44   : > { %s1103_s27 = scalar_select %p963_p7, 1, 0 }
  0x45   : > { %s197_s4 = sand.u32 1, %s782_s14   ;;  %p46_p9 = scmp.eq.s32.totalorder %s43_s30, 0 }
  0x46   : > { %s489_s29 = sshll.u32 %s197_s4, 3  ;;  %s509_s5 = sshll.u32 %s790_s16, 7 }
  0x47   : > { %s972_s6 = scalar_select %p46_p9, %s782_s14, %s48_s28  }
  0x48   : > { %s977_s26 = scalar_lea.hbm %s1089_s0, %s509_s5  ;;  %s201_s21 = scalar_lea.vmem [#allocation2], %s489_s29 }
  0x49   : > { %s209_s9 = sshll.u32 %s201_s21, 4  ;;  %p981_p2 = pnand %p557_p3, %p57_p5  ;;  %s985_s9 = int_to_ptr.vmem [resolvable:$true] %s209_s9 }
  0x4a   : > { %s987_s19 = scalar_lea.sflag [#allocation3], %s197_s4  ;;  %s678_s28 = scalar_lea.hbm %s977_s26, 128 }
  0x4b   : > { %p679_p11 = scmp.ne.s32.totalorder %s977_s26, %s678_s28  ;;  %p680_p12 = pneg %p981_p2 }
  0x4c   : > { %s683_s5 = scalar_lea.hbm %s1089_s0, 256  ;;  %p684_p4 = scmp.lt.u32.totalorder %s977_s26, %s1089_s0 }
  0x4d   : > { %p681_p0 = pnand %p680_p12, %p679_p11  ;;  %p685_p13 = scmp.lt.u32.totalorder %s683_s5, %s678_s28 }
  0x4e   : > { %p687_p10 = scmp.lt.u32.totalorder %s678_s28, %s977_s26 }
  0x4f   : > { %p682_p1 = pneg %p681_p0  ;;  %p686_p6 = por %p685_p13, %p684_p4 }
  0x51   : > { %p688_p3 = por %p687_p10, %p686_p6 }
  0x53   : > { %p689_p5 = pnand %p688_p3, %p682_p1 }
  0x55   : > { %692 = shalt.err (!%p689_p5)
}
  0x56   : > { %s693_s4 = scalar_lea.vmem %s985_s9, 128  ;;  %s800_s21 = smov [#allocation2]  }
  0x57   : > { %p694_p9 = scmp.ne.s32.totalorder %s985_s9, %s693_s4  ;;  %s698_s30 = sshll.u32 %s800_s21, 4  ;;  %s699_s30 = int_to_ptr.vmem [resolvable:$false] %s698_s30 }
  0x58   : > { %s700_s29 = scalar_lea.vmem %s699_s30, 256  ;;  %p701_p7 = scmp.lt.s32.totalorder %s985_s9, %s699_s30 }
  0x59   : > { %p696_p11 = pnand %p694_p9, %p680_p12  ;;  %p702_p4 = scmp.lt.s32.totalorder %s700_s29, %s693_s4 }
  0x5b   : > { %p697_p0 = pneg %p696_p11  ;;  %p703_p13 = por %p702_p4, %p701_p7 }
  0x5d   : > { %p704_p6 = pnand %p703_p13, %p697_p0 }
  0x5f   : > { %707 = shalt.err (!%p704_p6)
}
  0x60   : > { %550 = dma.hbm_to_vmem [thread:$0]  (!%p981_p2), %s977_s26, 128, %s985_s9, %s987_s19, %s798_s11, %s798_s11, %s799_s18  }
  0x61   : > { %221 = sbr.rel (%p880_p8) target bundleno = 356 (0x164), region = 32  ;;  %s1021_s28 = sand.u32 (!%p880_p8), 1, %s778_s13  }
  0x62   : > { %s493_s5 = sshll.u32 (!%p880_p8), %s1021_s28, 3  ;;  %s224_s7 = scalar_lea.sflag (!%p880_p8), [#allocation3], %s1021_s28 }
  0x63   : > { %s227_s8 = scalar_lea.vmem (!%p880_p8), [#allocation2], %s493_s5  ;;  %p1105_p7 = scmp.ne.s32.totalorder (!%p880_p8), %s1099_s22, 0 }
  0x68   : > { %761 = dma.done.wait (%p1105_p7), %s224_s7, 128  }
  0x69   : > { %763 = vsyncadd (%p1105_p7), %s224_s7, 4294967168  ;;  %p1106_p12 = scmp.ne.s32.totalorder %s1097_s20, 0 }
  0x6b   : > { %765 = dma.done.wait (%p1106_p12), [#allocation6], 528  }
  0x6c   : > { %767 = vsyncadd (%p1106_p12), [#allocation6], 4294966768  ;;  %v801_v0 = vmov 0.0   ;;  %vm802_vm0 = vmmov 0   ;;  %v617_v1 = vld [vmem:[#allocation5] sm:$0xff]   ;;  %v618_v2 = vld [vmem:[#allocation5 + $0x8] sm:$0xff]  }
  0x6d   : > { %516 = vmatprep.subr.bf16.mxu0 %v801_v0  ;;  %524 = vmatprep.mubr.msk.bf16.mxu0 %vm802_vm0, %v801_v0  ;;  %v619_v3 = vld [vmem:[#allocation5 + $0x10] sm:$0xff]   ;;  %v620_v4 = vld [vmem:[#allocation5 + $0x18] sm:$0xff]   ;;  %vm308_vm1 = vcmask 523264   ;;  %s496_s20 = sshll.u32 %s1021_s28, 4  ;;  %v497_v6 = vld [vmem:[#allocation7] ss:$0 sm:$0xff] }
  0x6e   : > { %517 = vmatpush3.bf16.msra.mxu0 %v617_v1  ;;  %v621_v5 = vld [vmem:[%s227_s8] sm:$0xff]   ;;  %s257_s22 = scalar_lea.vmem [#allocation8], %s496_s20  ;;  %s510_s11 = sshll.u32 %s786_s15, 8 }
  0x6f   : > { %518 = vmatprep.subr.bf16.mxu0 %v801_v0  ;;  %s370_s24 = sshll.u32 %s257_s22, 4  ;;  %s1040_s9 = scalar_lea.hbm %s1092_s3, %s510_s11  ;;  %s1035_s24 = int_to_ptr.vmem [resolvable:$true] %s370_s24 }
  0x70   : > { %s356_s10 = scalar_lea.sflag [#allocation4], %s1021_s28  ;;  %s708_s15 = scalar_lea.vmem %s1035_s24, 256 }
  0x71   : > { %p709_p8 = scmp.ne.s32.totalorder %s1035_s24, %s708_s15  ;;  %p1107_p2 = scmp.ne.s32.totalorder %s1103_s27, 0 }
  0x72   : > { %519 = vmatpush3.bf16.msra.mxu0 %v618_v2  ;;  %s803_s19 = smov [#allocation8]  }
  0x73   : > { %520 = vmatprep.subr.bf16.mxu0 %v801_v0  ;;  %p710_p1 = pnand %p709_p8, %p1107_p2  ;;  %s712_s4 = sshll.u32 %s803_s19, 4  ;;  %s713_s4 = int_to_ptr.vmem [resolvable:$false] %s712_s4 }
  0x74   : > { %s714_s21 = scalar_lea.vmem %s713_s4, 512  ;;  %p715_p3 = scmp.lt.s32.totalorder %s1035_s24, %s713_s4 }
  0x75   : > { %p711_p10 = pneg %p710_p1  ;;  %p716_p5 = scmp.lt.s32.totalorder %s714_s21, %s708_s15 }
  0x76   : > { %521 = vmatpush3.bf16.msra.mxu0 %v619_v3 }
  0x77   : > { %522 = vmatprep.subr.bf16.mxu0 %v801_v0  ;;  %p717_p9 = por %p716_p5, %p715_p3 }
  0x79   : > { %p718_p11 = pnand %p717_p9, %p711_p10 }
  0x7a   : > { %523 = vmatpush3.bf16.msra.mxu0 %v620_v4 }
  0x7d   : > { %525 = vmatmul.mubr.msk.bf16.vlgmr.msra.gmra.mrb[0].mxu0 %vm308_vm1, %v621_v5 }
 0x150   : > { %v346_v7 = vpop.f32.mrb[0].mxu0 }
 0x151   : > { %v347_v8 = vadd.f32 %v497_v6, %v346_v7  ;;  %v526_v9 = vpop.f32.mrb[1].mxu0 }
 0x152   : > { %v349_v10 = vpop.f32.mrb[2].mxu0 }
 0x153   : > { %353 = vst [vmem:[%s257_s22] sm:$0xff] %v347_v8  ;;  %v350_v11 = vadd.f32 %v497_v6, %v349_v10  ;;  %v527_v12 = vpop.f32.mrb[3].mxu0 }
 0x155   : > { %354 = vst [vmem:[%s257_s22 + $0x8] sm:$0xff] %v350_v11 }
 0x156   : > { %721 = shalt.err (!%p718_p11)
}
 0x157   : > { %s722_s30 = scalar_lea.hbm %s1040_s9, 256  ;;  %s726_s7 = scalar_lea.hbm %s1092_s3, 512 }
 0x158   : > { %p723_p0 = scmp.ne.s32.totalorder %s1040_s9, %s722_s30  ;;  %p727_p6 = scmp.lt.u32.totalorder %s1040_s9, %s1092_s3 }
 0x159   : > { %p728_p7 = scmp.lt.u32.totalorder %s726_s7, %s722_s30  ;;  %p730_p8 = scmp.lt.u32.totalorder %s722_s30, %s1040_s9 }
 0x15a   : > { %p724_p4 = pnand %p723_p0, %p1107_p2 }
 0x15b   : > { %p729_p12 = por %p728_p7, %p727_p6 }
 0x15c   : > { %p725_p13 = pneg %p724_p4 }
 0x15d   : > { %p731_p1 = por %p730_p8, %p729_p12 }
 0x15f   : > { %p732_p10 = pnand %p731_p1, %p725_p13 }
 0x161   : > { %735 = shalt.err (!%p732_p10)
}
 0x162   : > { %s804_s22 = smov 128   ;;  %s805_s11 = smov 8  }
 0x163   : > { %538 = dma.vmem_to_hbm [thread:$0]  (%p1107_p2), %s1035_s24, 256, %s1040_s9, %s356_s10, %s804_s22, %s804_s22, %s805_s11  }
 0x164 PF: > { %s385_s18 = sand.u32 1, %s774_s12   ;;  %p1108_p3 = scmp.ne.s32.totalorder %s1100_s23, 0 }
 0x165   : > { %p1109_p5 = scmp.ge.s32.totalorder %s794_s17, 2  ;;  %s386_s26 = scalar_lea.sflag [#allocation4], %s385_s18 }
 0x167   : > { %p552_p9 = pnand %p1109_p5, %p1108_p3 }
 0x169   : > { %769 = dma.done.wait (!%p552_p9), %s386_s26, 256  }
 0x16a   : > { %771 = vsyncadd (!%p552_p9), %s386_s26, 4294967040  ;;  %s20_s17 = sadd.s32 1, %s794_s17   ;;  %s1110_s12 = smov %s778_s13 }
 0x16b   : > { %p17_p11 = scmp.ge.s32.totalorder %s20_s17, 4   ;;  %s1111_s13 = smov %s782_s14 }
 0x16c   : > { %s1112_s14 = smov %s972_s6  ;;  %s1113_s15 = smov %s790_s16 }
 0x16d   : > { %s1114_s16 = smov %s1116_s25  ;;  %19 = sbr.rel (!%p17_p11) target bundleno = 7 (0x7), region = 87 }
 0x174   :  { %391 = vsyncpa [#allocation3], 1 }
 0x175   :  { %393 = vsyncpa [#allocation3 + $0x1], 1 }
 0x176   :  { %394 = vsyncpa [#allocation6], 1 }
 0x177   :  { %395 = vsyncpa [#allocation4], 1 }
 0x178   :  { %397 = vsyncpa [#allocation4 + $0x1], 1 }

</bundles_post_ra>
